<compile_context>
chip_gen: v5e
topology: v5e:2x2
jax: 0.10.0
libtpu: 0.0.40
codegen_flags: <defaults>
</compile_context>

<pallas_src>
import jax
import jax.numpy as jnp
import numpy as np
from jax.experimental import pallas as pl
from jax.experimental.pallas import tpu as pltpu

H_PAD = 128  # fc1 hidden dim padded 100 -> 128 (lane-dense / MXU-aligned)


def _round_up(x, m):
    return ((x + m - 1) // m) * m


# ----------------------------------------------------------------------------
# Pallas kernel: fc1 -> Swish -> fc2 -> softmax(dim=1) on one (TB, F) batch tile.
# ----------------------------------------------------------------------------
def classifier_head_kernel(x_ref, w1_ref, b1_ref, w2_ref, b2_ref, out_ref):
    x = x_ref[...]                                   # (TB, F)     bf16
    w1 = w1_ref[...]                                 # (F, 128)    bf16
    b1 = b1_ref[...]                                 # (1, 128)    f32
    w2 = w2_ref[...]                                 # (128, C)    f32
    b2 = b2_ref[...]                                 # (1, C)      f32

    # fc1: bf16 x bf16 on the MXU, f32 accumulation.
    h = jnp.dot(x, w1, preferred_element_type=jnp.float32) + b1

    # Swish: h * sigmoid(h); sigmoid via exp (EUP) + approx reciprocal (EUP slot, ~free).
    sig = pl.reciprocal(1.0 + jnp.exp(-h), approx=True)
    h = h * sig                                      # padded lanes stay exactly 0

    # fc2 (f32 MXU, tiny N).
    logits = jnp.dot(h, w2, preferred_element_type=jnp.float32) + b2

    # Numerically-stable softmax over dim=1 (last axis).
    m = jnp.max(logits, axis=-1, keepdims=True)
    e = jnp.exp(logits - m)
    denom = jnp.sum(e, axis=-1, keepdims=True)
    out_ref[...] = e * pl.reciprocal(denom, approx=True)


# ----------------------------------------------------------------------------
# Wrapper: pads the hidden dim of the weights once, tiles the batch dimension.
# ----------------------------------------------------------------------------
def prepare_head_params(w1, b1, w2, b2):
    """Zero-pad hidden dim 100 -> H_PAD and pre-cast w1 to bf16 (done once)."""
    F, H1 = w1.shape
    C = w2.shape[1]
    w1p = jnp.zeros((F, H_PAD), jnp.float32).at[:, :H1].set(w1).astype(jnp.bfloat16)
    b1p = jnp.zeros((1, H_PAD), jnp.float32).at[:, :H1].set(b1.reshape(1, H1))
    w2p = jnp.zeros((H_PAD, C), jnp.float32).at[:H1, :].set(w2)
    b2p = b2.reshape(1, C).astype(jnp.float32)
    return w1p, b1p, w2p, b2p


def classifier_head(encoded, w1p, b1p, w2p, b2p, *, block_b=512):
    """encoded: (B, F) f32.  Returns (B, C) f32 softmax probabilities."""
    B, F = encoded.shape
    C = w2p.shape[1]

    # Batch tile: large multiple of 8, capped so small batches use a single step.
    TB = min(block_b, _round_up(B, 8))
    num_blocks = pl.cdiv(B, TB)
    Bp = num_blocks * TB

    # bf16 x halves HBM traffic of the only array that scales with B.
    x = encoded.astype(jnp.bfloat16)
    if Bp != B:
        x = jnp.pad(x, ((0, Bp - B), (0, 0)))        # row-independent math -> safe

    cost = pl.CostEstimate(
        flops=2 * Bp * (F * H_PAD + H_PAD * C),
        transcendentals=Bp * (H_PAD + C),
        bytes_accessed=(Bp * F * 2 + F * H_PAD * 2 + H_PAD * 4
                        + H_PAD * C * 4 + C * 4 + Bp * C * 4),
    )

    out = pl.pallas_call(
        classifier_head_kernel,
        out_shape=jax.ShapeDtypeStruct((Bp, C), jnp.float32),
        grid=(num_blocks,),
        in_specs=[
            pl.BlockSpec((TB, F), lambda i: (i, 0)),       # x: tiled over batch
            pl.BlockSpec((F, H_PAD), lambda i: (0, 0)),    # w1: resident
            pl.BlockSpec((1, H_PAD), lambda i: (0, 0)),    # b1: resident
            pl.BlockSpec((H_PAD, C), lambda i: (0, 0)),    # w2: resident
            pl.BlockSpec((1, C), lambda i: (0, 0)),        # b2: resident
        ],
        out_specs=pl.BlockSpec((TB, C), lambda i: (i, 0)),
        compiler_params=pltpu.CompilerParams(
            dimension_semantics=("parallel",)),            # v7x: shard across both TCs
        cost_estimate=cost,
    )(x, w1p, b1p, w2p, b2p)

    return out[:B] if Bp != B else out


# ----------------------------------------------------------------------------
# Deterministic stand-in encoder ("seq2vec"): one gather + one batched matmul
# for all 7 sequences (instead of 7 separate dispatches).
# ----------------------------------------------------------------------------
def simple_encoder(token_seqs, embed_table, proj_w, proj_b):
    # token_seqs: (7, B, L) int32
    emb = embed_table[token_seqs]                     # (7, B, L, E)
    pooled = jnp.mean(emb, axis=2)                    # (7, B, E)
    S, B, E = pooled.shape
    proj = pooled.reshape(S * B, E) @ proj_w + proj_b  # (7B, H) — single matmul
    H = proj.shape[-1]
    # Reorder to match concat([ques, q1, ..., q6], axis=1): (B, 7*H)
    return proj.reshape(S, B, H).transpose(1, 0, 2).reshape(B, S * H)


@jax.jit
def classifier_forward(token_seqs, embed_table, proj_w, proj_b, w1p, b1p, w2p, b2p):
    encoded = simple_encoder(token_seqs, embed_table, proj_w, proj_b)   # (B, 7H)
    return classifier_head(encoded, w1p, b1p, w2p, b2p)                 # (B, 6)


# Pure-JAX reference of the same forward (unpadded f32 weights) for a sanity check.
def reference_forward(token_seqs, embed_table, proj_w, proj_b, w1, b1, w2, b2):
    encoded = simple_encoder(token_seqs, embed_table, proj_w, proj_b)
    h = encoded @ w1 + b1
    h = h * jax.nn.sigmoid(h)
    logits = h @ w2 + b2
    return jax.nn.softmax(logits, axis=1)


if __name__ == "__main__":
    # Small shapes consistent with the module
    batch_size = 8
    hidden_size = 32
    embed_size = 16
    dict_size = 50
    maxlength = 8
    num_classes = 6

    key = jax.random.PRNGKey(0)
    keys = jax.random.split(key, 8)

    # Parameters (deterministic init, not a checkpoint load)
    embed_table = 0.02 * jax.random.normal(keys[0], (dict_size, embed_size), jnp.float32)
    proj_w = 0.02 * jax.random.normal(keys[1], (embed_size, hidden_size), jnp.float32)
    proj_b = 0.02 * jax.random.normal(keys[2], (hidden_size,), jnp.float32)

    w1 = 0.02 * jax.random.normal(keys[3], (hidden_size * 7, 100), jnp.float32)
    b1 = 0.02 * jax.random.normal(keys[4], (100,), jnp.float32)
    w2 = 0.02 * jax.random.normal(keys[5], (100, num_classes), jnp.float32)
    b2 = 0.02 * jax.random.normal(keys[6], (num_classes,), jnp.float32)

    # Inputs: ques, q1..q6 as a stacked (7, B, maxlength) token-id tensor
    token_seqs = jax.random.randint(
        keys[7], (7, batch_size, maxlength), 0, dict_size, jnp.int32)

    # One-time weight padding (100 -> 128) + bf16 cast of w1
    w1p, b1p, w2p, b2p = prepare_head_params(w1, b1, w2, b2)

    probs = classifier_forward(token_seqs, embed_table, proj_w, proj_b,
                               w1p, b1p, w2p, b2p)
    probs = jax.block_until_ready(probs)

    # sanity: shape, rows sum to ~1, matches f32 reference
    ref = reference_forward(token_seqs, embed_table, proj_w, proj_b, w1, b1, w2, b2)
    row_sums = jnp.sum(probs, axis=1)
    assert probs.shape == (batch_size, num_classes)
    assert bool(jnp.all(jnp.abs(row_sums - 1.0) < 5e-3))
    assert np.allclose(np.asarray(probs), np.asarray(ref), atol=2e-2)

    print("KERNEL_OK")
</pallas_src>

<mosaic_0001>
module attributes {stable_mosaic.version = 11 : i64} {
  func.func @classifier_head_kernel(%arg0: i32, %arg1: memref<8x224xbf16, #tpu.memory_space<vmem>>, %arg2: memref<224x128xbf16, #tpu.memory_space<vmem>>, %arg3: memref<1x128xf32, #tpu.memory_space<vmem>>, %arg4: memref<128x6xf32, #tpu.memory_space<vmem>>, %arg5: memref<1x6xf32, #tpu.memory_space<vmem>>, %arg6: memref<8x6xf32, #tpu.memory_space<vmem>>) attributes {dimension_semantics = [#tpu.dimension_semantics<parallel>], iteration_bounds = array<i64: 1>, scalar_prefetch = 0 : i64, scratch_operands = 0 : i64, tpu.core_type = #tpu.core_type<tc>, window_params = [{transform_indices = @transform_0, window_bounds = array<i64: 8, 224>}, {pipeline_mode = #tpu.pipeline_mode<synchronous>, transform_indices = @transform_1, window_bounds = array<i64: 224, 128>}, {pipeline_mode = #tpu.pipeline_mode<synchronous>, transform_indices = @transform_2, window_bounds = array<i64: 1, 128>}, {pipeline_mode = #tpu.pipeline_mode<synchronous>, transform_indices = @transform_3, window_bounds = array<i64: 128, 6>}, {pipeline_mode = #tpu.pipeline_mode<synchronous>, transform_indices = @transform_4, window_bounds = array<i64: 1, 6>}, {transform_indices = @transform_5, window_bounds = array<i64: 8, 6>}]} {
    %c0 = arith.constant 0 : index
    %c0_0 = arith.constant 0 : index
    %0 = vector.load %arg1[%c0, %c0_0] : memref<8x224xbf16, #tpu.memory_space<vmem>>, vector<8x224xbf16>
    %c0_1 = arith.constant 0 : index
    %c0_2 = arith.constant 0 : index
    %1 = vector.load %arg2[%c0_1, %c0_2] : memref<224x128xbf16, #tpu.memory_space<vmem>>, vector<224x128xbf16>
    %c0_3 = arith.constant 0 : index
    %c0_4 = arith.constant 0 : index
    %2 = vector.load %arg3[%c0_3, %c0_4] : memref<1x128xf32, #tpu.memory_space<vmem>>, vector<1x128xf32>
    %c0_5 = arith.constant 0 : index
    %c0_6 = arith.constant 0 : index
    %3 = vector.load %arg4[%c0_5, %c0_6] : memref<128x6xf32, #tpu.memory_space<vmem>>, vector<128x6xf32>
    %c0_7 = arith.constant 0 : index
    %c0_8 = arith.constant 0 : index
    %4 = vector.load %arg5[%c0_7, %c0_8] : memref<1x6xf32, #tpu.memory_space<vmem>>, vector<1x6xf32>
    %cst = arith.constant dense<0.000000e+00> : vector<8x128xf32>
    %5 = tpu.matmul %0, %1, %cst {dimension_numbers = #tpu.dot_dimension_numbers<[1], [0], [0], [1], [0, 0, 1, 1], [], []>} : vector<8x224xbf16>, vector<224x128xbf16>, vector<8x128xf32> -> vector<8x128xf32>
    %6 = vector.broadcast %2 : vector<1x128xf32> to vector<8x128xf32>
    %7 = arith.addf %5, %6 : vector<8x128xf32>
    %cst_9 = arith.constant 0.000000e+00 : f32
    %8 = vector.broadcast %cst_9 : f32 to vector<8x128xf32>
    %9 = arith.subf %8, %7 : vector<8x128xf32>
    %10 = math.exp %9 : vector<8x128xf32>
    %cst_10 = arith.constant 1.000000e+00 : f32
    %11 = vector.broadcast %cst_10 : f32 to vector<8x128xf32>
    %12 = arith.addf %11, %10 : vector<8x128xf32>
    %13 = tpu.reciprocal %12 {approx = true} : vector<8x128xf32> -> vector<8x128xf32>
    %14 = arith.mulf %7, %13 : vector<8x128xf32>
    %cst_11 = arith.constant dense<0.000000e+00> : vector<8x6xf32>
    %15 = tpu.matmul %14, %3, %cst_11 {dimension_numbers = #tpu.dot_dimension_numbers<[1], [0], [0], [1], [0, 0, 1, 1], [], []>} : vector<8x128xf32>, vector<128x6xf32>, vector<8x6xf32> -> vector<8x6xf32>
    %16 = vector.broadcast %4 : vector<1x6xf32> to vector<8x6xf32>
    %17 = arith.addf %15, %16 : vector<8x6xf32>
    %cst_12 = arith.constant dense<0xFF800000> : vector<8xf32>
    %18 = vector.multi_reduction <maximumf>, %17, %cst_12 [1] : vector<8x6xf32> to vector<8xf32>
    %19 = vector.shape_cast %18 : vector<8xf32> to vector<8x1xf32>
    %20 = vector.broadcast %19 : vector<8x1xf32> to vector<8x6xf32>
    %21 = arith.subf %17, %20 : vector<8x6xf32>
    %22 = math.exp %21 : vector<8x6xf32>
    %cst_13 = arith.constant dense<0.000000e+00> : vector<8xf32>
    %23 = vector.multi_reduction <add>, %22, %cst_13 [1] : vector<8x6xf32> to vector<8xf32>
    %24 = vector.shape_cast %23 : vector<8xf32> to vector<8x1xf32>
    %25 = tpu.reciprocal %24 {approx = true} : vector<8x1xf32> -> vector<8x1xf32>
    %26 = vector.broadcast %25 : vector<8x1xf32> to vector<8x6xf32>
    %27 = arith.mulf %22, %26 : vector<8x6xf32>
    %c0_14 = arith.constant 0 : index
    %c0_15 = arith.constant 0 : index
    %28 = vector.load %arg6[%c0_14, %c0_15] : memref<8x6xf32, #tpu.memory_space<vmem>>, vector<8x6xf32>
    tpu.vector_store %arg6[%c0_14, %c0_15], %27 {strides = array<i32>} : memref<8x6xf32, #tpu.memory_space<vmem>>, vector<8x6xf32>,
    return
  }
  func.func @transform_0(%arg0: i32) -> (i32, i32) {
    %c0_i32 = arith.constant 0 : i32
    %c0_i32_0 = arith.constant 0 : i32
    return %arg0, %c0_i32 : i32, i32
  }
  func.func @transform_1(%arg0: i32) -> (i32, i32) {
    %c0_i32 = arith.constant 0 : i32
    %c0_i32_0 = arith.constant 0 : i32
    %c0_i32_1 = arith.constant 0 : i32
    return %c0_i32, %c0_i32_0 : i32, i32
  }
  func.func @transform_2(%arg0: i32) -> (i32, i32) {
    %c0_i32 = arith.constant 0 : i32
    %c0_i32_0 = arith.constant 0 : i32
    %c0_i32_1 = arith.constant 0 : i32
    return %c0_i32, %c0_i32_0 : i32, i32
  }
  func.func @transform_3(%arg0: i32) -> (i32, i32) {
    %c0_i32 = arith.constant 0 : i32
    %c0_i32_0 = arith.constant 0 : i32
    %c0_i32_1 = arith.constant 0 : i32
    return %c0_i32, %c0_i32_0 : i32, i32
  }
  func.func @transform_4(%arg0: i32) -> (i32, i32) {
    %c0_i32 = arith.constant 0 : i32
    %c0_i32_0 = arith.constant 0 : i32
    %c0_i32_1 = arith.constant 0 : i32
    return %c0_i32, %c0_i32_0 : i32, i32
  }
  func.func @transform_5(%arg0: i32) -> (i32, i32) {
    %c0_i32 = arith.constant 0 : i32
    %c0_i32_0 = arith.constant 0 : i32
    return %arg0, %c0_i32 : i32, i32
  }
}

</mosaic_0001>

<bundles_post_ra>
// kernel: classifier_forward.1
= control target key start
LH: loop header
LB: loop body
LE: loop exit
PB: predicated region body
PF: predicated region fallthrough
CT: control target
= control target key end

     0   :  { %s494_s0 = inlined_call_operand.vmem [shape: bf16[8,224], index: 0, kind: input, shape index: {}]   ;;  %s495_s1 = inlined_call_operand.vmem [shape: bf16[224,128], index: 1, kind: input, shape index: {}]   ;;  %s496_s2 = inlined_call_operand.vmem [shape: f32[1,128], index: 2, kind: input, shape index: {}]   ;;  %s497_s3 = inlined_call_operand.vmem [shape: f32[128,6], index: 3, kind: input, shape index: {}]   ;;  %s498_s4 = inlined_call_operand.vmem [shape: f32[1,6], index: 4, kind: input, shape index: {}]   ;;  %s499_s5 = inlined_call_operand.hbm [shape: f32[8,6], index: 5, kind: output, shape index: {}]  }
   0x1   :  { %v314_v0 = vld [vmem:[%s495_s1 + $0x38] sm:$0xff]  ;;  %v320_v1 = vld [vmem:[%s495_s1 + $0x68] sm:$0xff]  ;;  %v313_v2 = vld [vmem:[%s495_s1 + $0x30] sm:$0xff] }
   0x2   :  { %166 = vmatpush.bf16.msra.mxu0 %v314_v0  ;;  %181 = vmatpush.bf16.msra.mxu1 %v320_v1  ;;  %v319_v3 = vld [vmem:[%s495_s1 + $0x60] sm:$0xff] }
   0x3   :  { %10 = vsyncpa [#allocation3], 0  ;;  %v312_v4 = vld [vmem:[%s495_s1 + $0x28] sm:$0xff]  ;;  %v318_v5 = vld [vmem:[%s495_s1 + $0x58] sm:$0xff]  ;;  %vm162_vm0 = vcmask 785408   ;;  %vm221_vm1 = vcmask 48128  }
   0x4   :  { %v311_v6 = vld [vmem:[%s495_s1 + $0x20] sm:$0xff]  ;;  %v317_v7 = vld [vmem:[%s495_s1 + $0x50] sm:$0xff]  ;;  %v310_v8 = vld [vmem:[%s495_s1 + $0x18] sm:$0xff]  ;;  %s241_s6 = sshll.u32 %s499_s5, 4  ;;  %s242_s6 = int_to_ptr.hbm [resolvable:$true] %s241_s6 }
   0x5   :  { %v316_v9 = vld [vmem:[%s495_s1 + $0x48] sm:$0xff]  ;;  %v22_v10 = vld [vmem:[%s494_s0] sm:$0xff]  ;;  %v309_v12 = vld [vmem:[%s495_s1 + $0x10] sm:$0xff] }
   0x6   :  { %167 = vmatpush.bf16.msra.mxu0 %v313_v2  ;;  %182 = vmatpush.bf16.msra.mxu1 %v319_v3  ;;  %v74_v11 = vunpack.c.h.b16 %v22_v10  ;;  %v315_v13 = vld [vmem:[%s495_s1 + $0x40] sm:$0xff]  ;;  %v308_v15 = vld [vmem:[%s495_s1 + $0x8] sm:$0xff]  ;;  %v73_v16 = vunpack.c.l.b16 %v22_v10  ;;  %v67_v19 = vld [vmem:[%s497_s3 + $0x78] sm:$0xff] }
   0x7   :  { %v307_v17 = vld [vmem:[%s495_s1] sm:$0xff]  ;;  %v66_v20 = vld [vmem:[%s497_s3 + $0x70] sm:$0xff]  ;;  %201 = vmatpush.msra.mxu2 %v67_v19  ;;  %v65_v21 = vld [vmem:[%s497_s3 + $0x68] sm:$0xff] }
   0x8   :  { %v76_v14 = vpack.c.b16 %v74_v11, %v74_v11  ;;  %v75_v18 = vpack.c.b16 %v73_v16, %v73_v16  ;;  %v64_v22 = vld [vmem:[%s497_s3 + $0x60] sm:$0xff]  ;;  %v63_v23 = vld [vmem:[%s497_s3 + $0x58] sm:$0xff]  ;;  %v62_v24 = vld [vmem:[%s497_s3 + $0x50] sm:$0xff] }
   0x9   :  { %202 = vmatpush.msra.mxu2 %v66_v20  ;;  %v61_v25 = vld [vmem:[%s497_s3 + $0x48] sm:$0xff]  ;;  %v60_v26 = vld [vmem:[%s497_s3 + $0x40] sm:$0xff]  ;;  %v59_v27 = vld [vmem:[%s497_s3 + $0x38] sm:$0xff] }
   0xa   :  { %168 = vmatpush.bf16.msra.mxu0 %v312_v4  ;;  %183 = vmatpush.bf16.msra.mxu1 %v318_v5  ;;  %v58_v28 = vld [vmem:[%s497_s3 + $0x30] sm:$0xff]  ;;  %v57_v29 = vld [vmem:[%s497_s3 + $0x28] sm:$0xff]  ;;  %v56_v30 = vld [vmem:[%s497_s3 + $0x20] sm:$0xff] }
   0xb   :  { %203 = vmatpush.msra.mxu2 %v65_v21  ;;  %v55_v31 = vld [vmem:[%s497_s3 + $0x18] sm:$0xff]  ;;  %v54_v32 = vld [vmem:[%s497_s3 + $0x10] sm:$0xff]  ;;  %v53_v33 = vld [vmem:[%s497_s3 + $0x8] sm:$0xff] }
   0xc   :  { %v52_v34 = vld [vmem:[%s497_s3] sm:$0xff] }
   0xd   :  { %204 = vmatpush.msra.mxu2 %v64_v22  ;;  %v322_v36 = vld [vmem:[%s496_s2] ss:$0 sm:$0xff]  ;;  %s358_s2 = smov [#allocation2]  }
   0xe   :  { %169 = vmatpush.bf16.msra.mxu0 %v311_v6  ;;  %184 = vmatpush.bf16.msra.mxu1 %v317_v7  ;;  %v323_v48 = vld [vmem:[%s498_s4] ss:$0 sm:$0xff]  ;;  %s239_s29 = sshll.u32 %s358_s2, 4  ;;  %s240_s29 = int_to_ptr.vmem [resolvable:$true] %s239_s29 }
   0xf   :  { %205 = vmatpush.msra.mxu2 %v63_v23 }
  0x11   :  { %206 = vmatpush.msra.mxu2 %v62_v24 }
  0x12   :  { %170 = vmatpush.bf16.msra.mxu0 %v310_v8  ;;  %185 = vmatpush.bf16.msra.mxu1 %v316_v9 }
  0x13   :  { %207 = vmatpush.msra.mxu2 %v61_v25 }
  0x15   :  { %208 = vmatpush.msra.mxu2 %v60_v26 }
  0x16   :  { %171 = vmatpush.bf16.msra.mxu0 %v309_v12  ;;  %186 = vmatpush.bf16.msra.mxu1 %v315_v13 }
  0x17   :  { %209 = vmatpush.msra.mxu2 %v59_v27 }
  0x19   :  { %306 = vmatmul.msk.bf16.vlgmr.msra.gmra.mxu1 %vm162_vm0, %v76_v14  ;;  %210 = vmatpush.msra.mxu2 %v58_v28 }
  0x1a   :  { %172 = vmatpush.bf16.msra.mxu0 %v308_v15 }
  0x1b   :  { %211 = vmatpush.msra.mxu2 %v57_v29 }
  0x1d   :  { %212 = vmatpush.msra.mxu2 %v56_v30 }
  0x1e   :  { %173 = vmatpush.bf16.msra.mxu0 %v307_v17 }
  0x1f   :  { %213 = vmatpush.msra.mxu2 %v55_v31 }
  0x21   :  { %174 = vmatmul.bf16.vlgmr.msra.gmra.mxu0 %v75_v18  ;;  %214 = vmatpush.msra.mxu2 %v54_v32 }
  0x23   :  { %215 = vmatpush.msra.mxu2 %v53_v33 }
  0x25   :  { %216 = vmatpush.msra.mxu2 %v52_v34 }
  0x96   :  { %v188_v35 = vpop.f32.mrf.mxu1 }
  0x9e   :  { %v175_v37 = vpop.f32.mrf.mxu0  ;;  %v190_v38 = vpop.f32.mrf.mxu1 }
  0x9f   :  { %v176_v39 = vadd.f32 %v322_v36, %v175_v37 }
  0xa1   :  { %v189_v40 = vadd.f32 %v188_v35, %v176_v39 }
  0xa3   :  { %v192_v41 = vsub.f32 0.0, %v189_v40 }
  0xa5   :  { %v193_v42 = vmul.f32 1.442695, %v192_v41 }
  0xa6   :  { %v177_v43 = vpop.f32.mrf.mxu0 }
  0xa7   :  { %324 = vpow2.f32 %v193_v42 }
  0xad   :  { %v325_v44 = vpop.eup %324 }
  0xae   :  { %v195_v45 = vadd.f32 1.0, %v325_v44 }
  0xb0   :  { %326 = vrcp.f32 %v195_v45 }
  0xb6   :  { %v327_v46 = vpop.eup %326 }
  0xb7   :  { %v197_v47 = vmul.f32 %v327_v46, %v189_v40 }
  0xb9   :  { %217 = vmatmul.f32.vlgmr.msra.gmra.mxu2 %v197_v47 }
 0x13c   :  { %v218_v49 = vpop.f32.mrf.mxu2 }
 0x13d   :  { %v219_v50 = vadd.f32 %v323_v48, %v218_v49 }
 0x13f   :  { %v222_v51 = vsel %vm221_vm1, %v219_v50, -inf }
 0x140   :  { %223 = vmax.xlane.f32.xlu0 %v222_v51 }
 0x1b3   :  { %v224_v52 = vpop.xlane.xlu0 %223 }
 0x1b4   :  { %v225_v53 = vsub.f32 %v219_v50, %v224_v52 }
 0x1b6   :  { %v226_v54 = vmul.f32 1.442695, %v225_v53 }
 0x1b8   :  { %328 = vpow2.f32 %v226_v54 }
 0x1be   :  { %v329_v55 = vpop.eup %328 }
 0x1bf   :  { %v228_v56 = vsel %vm221_vm1, %v329_v55, 0.0 }
 0x1c0   :  { %229 = vadd.xlane.f32.xlu0 %v228_v56 }
 0x233   :  { %v230_v57 = vpop.xlane.xlu0 %229 }
 0x234   :  { %330 = vrcp.f32 %v230_v57 }
 0x23a   :  { %v331_v58 = vpop.eup %330 }
 0x23b   :  { %v232_v59 = vmul.f32 %v331_v58, %v329_v55 }
 0x23d   :  { %233 = vst.msk [vmem:[#allocation2] sm:$0xff] %vm221_vm1, %v232_v59 }
 0x23e   :  { %244 = dma.vmem_to_hbm [thread:$0]  %s240_s29, 128, %s242_s6, [#allocation3]  }
 0x23f   :  { %356 = dma.done.wait [#allocation3], 128  }
 0x240   :  { %357 = vsyncadd [#allocation3], 4294967168 }
 0x241   :  { %249 = vsyncpa [#allocation3], 1 }

</bundles_post_ra>
